<compile_context>
chip_gen: v6e
topology: v6e:2x2x1
jax: 0.10.0
libtpu: 0.0.40
codegen_flags: <defaults>
</compile_context>

<pallas_src>
import functools
import math

import numpy as np
import jax
import jax.numpy as jnp
from jax.experimental import pallas as pl
from jax.experimental.pallas import tpu as pltpu


def _round_up(v, m):
    return (v + m - 1) // m * m


def _gelu_exact(x):
    # PyTorch nn.GELU() default (approximate='none'): 0.5*x*(1+erf(x/sqrt(2)))
    return 0.5 * x * (1.0 + jax.lax.erf(x * (1.0 / math.sqrt(2.0))))


def _gelu_tanh(x):
    # tanh approximation: transcendental goes to the EUP (its own bundle slot).
    return jax.nn.gelu(x, approximate=True)


@functools.lru_cache(maxsize=None)
def _roll_shift_sign():
    """One-time probe of pltpu.roll's shift convention.

    Returns +1 if pltpu.roll(x, s, axis)[i] == x[(i - s) % n] (jnp.roll
    convention: elements move toward higher indices), else -1.  The conv's row
    shifts are derived from this so the kernel is correct either way.
    """
    def probe(x_ref, o_ref):
        o_ref[...] = pltpu.roll(x_ref[...], 1, axis=0)

    x = jnp.broadcast_to(jnp.arange(8, dtype=jnp.int32)[:, None], (8, 128))
    y = pl.pallas_call(probe,
                       out_shape=jax.ShapeDtypeStruct((8, 128), jnp.int32))(x)
    return 1 if int(y[1, 0]) == 0 else -1


def cglu_kernel(x_ref, w1_ref, b1_ref, dww_ref, dwb_ref, mask_ref,
                w2_ref, b2_ref, o_ref, *, roll_sign, approx_gelu):
    BT, H, W, Cin = x_ref.shape
    HIDP = dwb_ref.shape[1]
    N = BT * H * W

    # Flatten batch+spatial rows; operands are already in the matmul dtype
    # (the wrapper pre-casts x), accumulation is f32.
    x2d = x_ref[...].reshape(N, Cin)

    # Fused fc1: one MXU pass; the a/v split is at lane column HIDP (=128),
    # i.e. a vreg boundary, so it is free.
    h12 = jnp.dot(x2d, w1_ref[...], preferred_element_type=jnp.float32) + b1_ref[...]
    a = h12[:, :HIDP]            # conv branch
    v = h12[:, HIDP:]            # gate branch

    # Depthwise 3x3 conv (stride 1, pad 1, cross-correlation like nn.Conv2d),
    # computed fully in registers.  For tap (dh, dw) the flattened source row
    # of output row n is n + dh*W + dw; that shift is one pltpu.roll along the
    # sublane axis, and out-of-image sources are zeroed by the 0/1 mask table.
    # (Elementwise stage kept in f32: exact, and portable to v5e's f32-only VPU.)
    taps = dww_ref[...]                               # (9, HIDP) loaded once
    acc = a * taps[4:5, :] + dwb_ref[...]             # center tap: no shift/mask
    k = 0
    for dh in (-1, 0, 1):
        for dw in (-1, 0, 1):
            if dh == 0 and dw == 0:
                continue
            d = dh * W + dw                           # want shifted[n] = a[n + d]
            shift = (-d * roll_sign) % N              # convention-proof (probe)
            shifted = pltpu.roll(a, shift, axis=0)    # sublane rotation (XLU)
            m = mask_ref[:, k:k + 1]                  # (N, 1) 0/1 validity
            ti = (dh + 1) * 3 + (dw + 1)
            acc = acc + (shifted * m) * taps[ti:ti + 1, :]
            k += 1

    # GELU(dwconv(a)) * v
    act = _gelu_tanh(acc) if approx_gelu else _gelu_exact(acc)
    g = act * v                                       # (N, HIDP) f32

    # fc2 with UNPADDED Cout columns: no padded writeback, no external slice.
    out = jnp.dot(g.astype(w2_ref.dtype), w2_ref[...],
                  preferred_element_type=jnp.float32) + b2_ref[...]
    o_ref[...] = out.reshape(BT, H, W, -1).astype(o_ref.dtype)


def prepare_params(w1, b1, dww_3x3, dwb, w2, b2, *, matmul_dtype=jnp.bfloat16):
    """Fuse fc1, zero-pad hidden dim to 128 lanes, pre-cast matmul weights.

    Padded hidden lanes carry zeros through fc1/conv/GELU/gate and hit zero
    rows of w2, so the math stays exact.  fc2 keeps its true Cout columns.
    bf16 operands (f32 accumulation) are the MXU fast path on v5e/v6e/v7x.
    """
    Cin, two_hid = w1.shape
    hid = two_hid // 2
    Cout = w2.shape[1]
    HIDP = _round_up(hid, 128)

    # Fused fc1: [conv branch | gate branch], each branch padded to HIDP lanes.
    w1p = jnp.zeros((Cin, 2 * HIDP), matmul_dtype)
    w1p = w1p.at[:, :hid].set(w1[:, :hid].astype(matmul_dtype))
    w1p = w1p.at[:, HIDP:HIDP + hid].set(w1[:, hid:].astype(matmul_dtype))
    b1p = jnp.zeros((1, 2 * HIDP), jnp.float32)
    b1p = b1p.at[:, :hid].set(b1[:, :hid])
    b1p = b1p.at[:, HIDP:HIDP + hid].set(b1[:, hid:])

    dww = jnp.zeros((9, HIDP), jnp.float32).at[:, :hid].set(
        dww_3x3.reshape(9, hid))                      # tap-major, f32 conv
    dwbp = jnp.zeros((1, HIDP), jnp.float32).at[:, :hid].set(dwb)

    w2p = jnp.zeros((HIDP, Cout), matmul_dtype).at[:hid, :].set(
        w2.astype(matmul_dtype))                      # unpadded output channels
    b2p = b2.astype(jnp.float32).reshape(1, Cout)

    return (w1p, b1p, dww, dwbp, w2p, b2p)


def _make_shift_masks(bt, H, W):
    """(bt*H*W, 8) f32: column k is 1.0 where source (h+dh, w+dw) of the k-th
    non-center tap is inside the image at that flattened output row."""
    n = np.arange(bt * H * W)
    h = (n // W) % H
    w = n % W
    cols = []
    for dh in (-1, 0, 1):
        for dw in (-1, 0, 1):
            if dh == 0 and dw == 0:
                continue
            ok = (h + dh >= 0) & (h + dh < H) & (w + dw >= 0) & (w + dw < W)
            cols.append(ok)
    return np.stack(cols, axis=1).astype(np.float32)


@functools.partial(jax.jit, static_argnames=("bt", "roll_sign", "approx_gelu"))
def _cglu_call(x, w1p, b1p, dww, dwbp, masks, w2p, b2p, *,
               bt, roll_sign, approx_gelu):
    B, H, W, Cin = x.shape
    HIDP = dwbp.shape[1]
    Cout = w2p.shape[1]
    N = bt * H * W
    out_dtype = x.dtype
    x = x.astype(w1p.dtype)        # halves the x DMA on the bf16 fast path
    grid = (B // bt,)

    kernel = functools.partial(cglu_kernel, roll_sign=roll_sign,
                               approx_gelu=approx_gelu)
    return pl.pallas_call(
        kernel,
        out_shape=jax.ShapeDtypeStruct((B, H, W, Cout), out_dtype),
        grid_spec=pltpu.PrefetchScalarGridSpec(
            num_scalar_prefetch=0,
            grid=grid,
            in_specs=[
                pl.BlockSpec((bt, H, W, Cin), lambda b: (b, 0, 0, 0)),  # x tile
                pl.BlockSpec((Cin, 2 * HIDP), lambda b: (0, 0)),        # fc1 w (fused, resident)
                pl.BlockSpec((1, 2 * HIDP), lambda b: (0, 0)),          # fc1 b
                pl.BlockSpec((9, HIDP), lambda b: (0, 0)),              # dw taps
                pl.BlockSpec((1, HIDP), lambda b: (0, 0)),              # dw bias
                pl.BlockSpec((N, 8), lambda b: (0, 0)),                 # shift masks
                pl.BlockSpec((HIDP, Cout), lambda b: (0, 0)),           # fc2 w
                pl.BlockSpec((1, Cout), lambda b: (0, 0)),              # fc2 b
            ],
            out_specs=pl.BlockSpec((bt, H, W, Cout), lambda b: (b, 0, 0, 0)),
        ),
        compiler_params=pltpu.CompilerParams(
            dimension_semantics=("parallel",),      # shard batch tiles on v7x's 2 TCs
            vmem_limit_bytes=48 * 1024 * 1024,      # < v7x's 64 MiB; actual use is a few MiB
        ),
    )(x, w1p, b1p, dww, dwbp, masks, w2p, b2p)


def convolutional_glu(x, params, *, out_features, rows_per_block=512,
                      approx_gelu=False):
    """ConvolutionalGLU.forward for NHWC `x` using the fused Pallas kernel."""
    w1p, b1p, dww, dwbp, w2p, b2p = params
    B, H, W, _ = x.shape
    assert w2p.shape[1] == out_features

    HW = H * W
    # Batch-tile with whole images only (3x3 conv needs full spatial context).
    # Aim for ~rows_per_block flattened rows per step, but keep >= 2 grid steps
    # when B >= 2 so both of v7x's TensorCores receive work.
    bt = max(1, min(B, -(-rows_per_block // HW)))
    if B >= 2:
        bt = min(bt, max(1, B // 2))
    while B % bt:                       # largest divisor of B not above target
        bt -= 1

    masks = jnp.asarray(_make_shift_masks(bt, H, W))
    return _cglu_call(x, w1p, b1p, dww, dwbp, masks, w2p, b2p,
                      bt=bt, roll_sign=_roll_shift_sign(),
                      approx_gelu=approx_gelu)


def reference(x, w1, b1, dww_3x3, dwb, w2, b2):
    """Pure-JAX f32 reference of ConvolutionalGLU.forward (drop=0.0)."""
    B, H, W, Cin = x.shape
    hid = dwb.shape[1]
    hp = jax.lax.Precision.HIGHEST

    x2 = x.reshape(B, H * W, Cin)
    h = jnp.einsum("bnc,cd->bnd", x2, w1, precision=hp) + b1
    a, v = h[..., :hid], h[..., hid:]

    a_img = a.reshape(B, H, W, hid)
    kern = dww_3x3.reshape(3, 3, 1, hid)                     # HWIO, depthwise
    conv = jax.lax.conv_general_dilated(
        a_img, kern, window_strides=(1, 1), padding="SAME",
        dimension_numbers=("NHWC", "HWIO", "NHWC"),
        feature_group_count=hid, precision=hp) + dwb.reshape(1, 1, 1, hid)

    g = _gelu_exact(conv).reshape(B, H * W, hid) * v
    out = jnp.einsum("bnh,ho->bno", g, w2, precision=hp) + b2
    return out.reshape(B, H, W, -1)


if __name__ == "__main__":
    # Shapes consistent with the module:
    #   in_features = 48, hidden_features = int(2*48/3) = 32, out_features = 48
    B, H, W = 2, 8, 8
    in_features = 48
    hidden = int(2 * in_features / 3)      # 32
    out_features = in_features             # 48

    key = jax.random.PRNGKey(0)
    ks = jax.random.split(key, 7)

    x = jax.random.normal(ks[0], (B, H, W, in_features), jnp.float32)

    # fc1: Linear(in_features -> 2*hidden)
    w1 = 0.1 * jax.random.normal(ks[1], (in_features, 2 * hidden), jnp.float32)
    b1 = 0.1 * jax.random.normal(ks[2], (1, 2 * hidden), jnp.float32)
    # dwconv: Conv2d(hidden, hidden, 3, padding=1, groups=hidden) -> taps (3,3,hidden)
    dww_3x3 = 0.1 * jax.random.normal(ks[3], (3, 3, hidden), jnp.float32)
    dwb = 0.1 * jax.random.normal(ks[4], (1, hidden), jnp.float32)
    # fc2: Linear(hidden -> out_features)
    w2 = 0.1 * jax.random.normal(ks[5], (hidden, out_features), jnp.float32)
    b2 = 0.1 * jax.random.normal(ks[6], (1, out_features), jnp.float32)

    ref = reference(x, w1, b1, dww_3x3, dwb, w2, b2)

    # 1) Exact mode (f32 matmul operands, exact-erf GELU).
    params_f32 = prepare_params(w1, b1, dww_3x3, dwb, w2, b2,
                                matmul_dtype=jnp.float32)
    out_f32 = jax.block_until_ready(
        convolutional_glu(x, params_f32, out_features=out_features))
    assert out_f32.shape == (B, H, W, out_features)
    assert jnp.allclose(out_f32, ref, rtol=2e-3, atol=2e-3), (
        float(jnp.max(jnp.abs(out_f32 - ref))))

    # 2) MXU fast path (bf16 operands, f32 accumulation) — all TPU generations.
    params_bf16 = prepare_params(w1, b1, dww_3x3, dwb, w2, b2,
                                 matmul_dtype=jnp.bfloat16)
    out_bf16 = jax.block_until_ready(
        convolutional_glu(x, params_bf16, out_features=out_features))
    assert jnp.allclose(out_bf16, ref, rtol=3e-2, atol=3e-2), (
        float(jnp.max(jnp.abs(out_bf16 - ref))))

    # 3) EUP path: tanh-approximate GELU (slightly looser tolerance).
    out_tanh = jax.block_until_ready(
        convolutional_glu(x, params_bf16, out_features=out_features,
                          approx_gelu=True))
    assert jnp.allclose(out_tanh, ref, rtol=5e-2, atol=5e-2), (
        float(jnp.max(jnp.abs(out_tanh - ref))))

    print("KERNEL_OK")
</pallas_src>

<mosaic_0001>
module attributes {stable_mosaic.version = 11 : i64} {
  func.func @probe(%arg0: memref<8x128xi32, #tpu.memory_space<vmem>>, %arg1: memref<8x128xi32, #tpu.memory_space<vmem>>) attributes {dimension_semantics = [], scalar_prefetch = 0 : i64, scratch_operands = 0 : i64, tpu.core_type = #tpu.core_type<tc>} {
    %c0 = arith.constant 0 : index
    %c0_0 = arith.constant 0 : index
    %0 = vector.load %arg0[%c0, %c0_0] : memref<8x128xi32, #tpu.memory_space<vmem>>, vector<8x128xi32>
    %c1_i32 = arith.constant 1 : i32
    %1 = tpu.dynamic_rotate %0 by %c1_i32 dim 0 : vector<8x128xi32>, i32 -> vector<8x128xi32>
    %c0_1 = arith.constant 0 : index
    %c0_2 = arith.constant 0 : index
    %2 = vector.load %arg1[%c0_1, %c0_2] : memref<8x128xi32, #tpu.memory_space<vmem>>, vector<8x128xi32>
    tpu.vector_store %arg1[%c0_1, %c0_2], %1 {strides = array<i32>} : memref<8x128xi32, #tpu.memory_space<vmem>>, vector<8x128xi32>,
    return
  }
}

</mosaic_0001>

<bundles_post_ra>
// kernel: tpu_custom_call.1
= control target key start
LH: loop header
LB: loop body
LE: loop exit
PB: predicated region body
PF: predicated region fallthrough
CT: control target
= control target key end

     0   :  { %6 = vsyncpa [#allocation3], 0  ;;  %s103_s0 = inlined_call_operand.hbm [shape: s32[8,128], index: 0, kind: input, shape index: {}]   ;;  %s104_s1 = inlined_call_operand.hbm [shape: s32[8,128], index: 1, kind: output, shape index: {}]  }
   0x1   :  { %7 = vsyncpa [#allocation4], 0  ;;  %s85_s6 = smov [#allocation2]  }
   0x2   :  { %s14_s7 = sshll.u32 %s85_s6, 4  ;;  %s15_s7 = int_to_ptr.vmem [resolvable:$true] %s14_s7 }
   0x3   :  { %s49_s8 = scalar_lea.vmem %s15_s7, 128  ;;  %p54_p1 = scmp.lt.s32.totalorder %s15_s7, %s15_s7 }
   0x4   :  { %p50_p0 = scmp.ne.s32.totalorder %s15_s7, %s49_s8  ;;  %p55_p2 = scmp.lt.s32.totalorder %s49_s8, %s49_s8 }
   0x6   :  { %p56_p3 = por %p55_p2, %p54_p1 }
   0x8   :  { %p57_p4 = pnand %p56_p3, %p50_p0 }
   0xa   :  { %60 = shalt.err (!%p57_p4)
}
   0xb   :  { %17 = dma.hbm_to_vmem [thread:$0]  %s103_s0, 128, %s15_s7, [#allocation3]  }
   0xc   :  { %81 = dma.done.wait [#allocation3], 128  }
   0xd   :  { %82 = vsyncadd [#allocation3], 4294967168  ;;  %s86_s11 = smov [#allocation5]   ;;  %v21_v0 = vld [vmem:[#allocation2] sm:$0xff] }
   0xe   :  { %s30_s12 = sshll.u32 %s86_s11, 4  ;;  %v22_v1 = vrot.slane %v21_v0, 7  ;;  %s31_s12 = int_to_ptr.vmem [resolvable:$true] %s30_s12 }
   0xf   :  { %s61_s13 = scalar_lea.vmem %s31_s12, 128  ;;  %p66_p6 = scmp.lt.s32.totalorder %s31_s12, %s31_s12 }
  0x10   :  { %23 = vst [vmem:[#allocation5] sm:$0xff] %v22_v1  ;;  %p62_p5 = scmp.ne.s32.totalorder %s31_s12, %s61_s13  ;;  %p67_p7 = scmp.lt.s32.totalorder %s61_s13, %s61_s13 }
  0x12   :  { %p68_p8 = por %p67_p7, %p66_p6 }
  0x14   :  { %p69_p9 = pnand %p68_p8, %p62_p5 }
  0x16   :  { %72 = shalt.err (!%p69_p9)
}
  0x17   :  { %33 = dma.vmem_to_hbm [thread:$0]  %s31_s12, 128, %s104_s1, [#allocation4]  }
  0x18   :  { %83 = dma.done.wait [#allocation4], 128  }
  0x19   :  { %84 = vsyncadd [#allocation4], 4294967168 }
  0x1a   :  { %37 = vsyncpa [#allocation3], 1 }
  0x1b   :  { %38 = vsyncpa [#allocation4], 1 }

</bundles_post_ra>
